<compile_context>
chip_gen: v5e
topology: v5e:2x2
jax: 0.10.0
libtpu: 0.0.40
codegen_flags: <defaults>
</compile_context>

<pallas_src>
import math

import jax
import jax.numpy as jnp
from jax.experimental import pallas as pl
from jax.experimental.pallas import tpu as pltpu

_LANE = 128
_TARGET_BLOCK_BYTES = 4 * 1024 * 1024   # ~4 MiB per output block (x2 buffers << 16 MiB)
_MIN_SPLIT_BYTES = 1 << 20              # only split across cores if >=1 MiB per core
_SMALL_TOTAL_ELEMS = 64 * 1024          # below this, plain XLA broadcast is faster
_MAX_PATTERN_ROWS = 512                 # cap on periodic-pattern size (rows of 128)


def _var_pattern_kernel(pat_ref, out_ref):
    """Fill the (block_rows, 128) output block with the (P, 128) periodic variance
    pattern.  Pure unmasked lane-dense stores; no dependence on mu."""
    p = pat_ref.shape[0]
    n = out_ref.shape[0]
    if p == 1:
        out_ref[...] = jnp.broadcast_to(pat_ref[...], out_ref.shape)
    else:
        reps = -(-n // p)  # ceil; static Python int
        tiled = jnp.tile(pat_ref[...], (reps, 1))
        out_ref[...] = tiled if reps * p == n else tiled[:n]


def _var_general_kernel(var_ref, out_ref):
    """Fallback: broadcast the (1, D) variance row into an (S_blk, B, D) block."""
    out_ref[...] = jnp.broadcast_to(var_ref[...][None, :, :], out_ref.shape)


def _num_tensorcores() -> int:
    """Best-effort TensorCore-per-device count (v5e/v6e: 1, v4/v5p/v7x: 2)."""
    try:
        d = jax.devices()[0]
        if getattr(d, "platform", "") != "tpu":
            return 1
        nc = getattr(d, "num_cores", None)
        if isinstance(nc, int) and nc >= 1:
            return nc
        kind = str(getattr(d, "device_kind", "")).lower()
        for tag in ("v4", "v5p", "v7"):
            if tag in kind:
                return 2
    except Exception:
        pass
    return 1


def _choose_block_rows(rows: int, itemsize: int, period_rows: int):
    """Pick (block_rows, grid) for the lane-dense (rows, 128) output."""
    # dtype-aware sublane alignment: 8 (f32) / 16 (bf16) / 32 (int8/fp8) rows,
    # and a multiple of the pattern period so every block starts pattern-aligned.
    sub_align = max(8, 32 // max(1, itemsize))
    row_align = sub_align * period_rows // math.gcd(sub_align, period_rows)
    bytes_per_row = _LANE * itemsize
    target_rows = max(row_align, _TARGET_BLOCK_BYTES // bytes_per_row)

    # Fewest blocks that keep each block <= ~4 MiB ...
    nblocks = max(1, -(-rows // target_rows))
    # ... and, on multi-TC chips, an even multiple of the core count (only if the
    # total output is big enough that splitting beats the per-step overhead).
    nc = _num_tensorcores()
    if nc > 1 and rows * bytes_per_row >= nc * _MIN_SPLIT_BYTES:
        nblocks = -(-max(nblocks, nc) // nc) * nc

    if nblocks <= 1:
        return rows, 1  # full-extent block is always a legal block shape

    per_block = -(-rows // nblocks)
    block_rows = -(-per_block // row_align) * row_align
    if block_rows >= rows:
        return rows, 1
    return block_rows, pl.cdiv(rows, block_rows)


def gaussian_likelihood_forward(mu, noise_std, *, min_pallas_elems=_SMALL_TOTAL_ELEMS):
    """Pallas equivalent of GaussianLikelihood.forward.

    Args:
      mu:        (S, B, D) float — no_samples x batch_size x out_size
      noise_std: (D,) float      — per-output noise std

    Returns:
      (obs_mu, obs_var), each (S, B, D).
    """
    S, B, D = mu.shape
    dtype = mu.dtype

    # obs_mu = mu is an identity: return the input directly (no HBM read/write).
    obs_mu = mu

    # Hoisted: per-output variance.
    var = jnp.square(noise_std).astype(dtype)  # (D,)

    total = S * B * D
    itemsize = jnp.dtype(dtype).itemsize

    # Tiny tensors: kernel launch + pipeline prologue dominate -> plain XLA fill.
    if total < min_pallas_elems:
        return obs_mu, jnp.broadcast_to(var, mu.shape)

    if total % _LANE == 0:
        # Lane-dense path: view (S, B, D) row-major as (rows, 128).  The flattened
        # variance is periodic with period lcm(D, 128) elements = P rows of 128,
        # so a (P, 128) pattern written at P-aligned row offsets reproduces it.
        rows = total // _LANE
        lcm_dl = D * _LANE // math.gcd(D, _LANE)
        period_rows = lcm_dl // _LANE
        if period_rows <= _MAX_PATTERN_ROWS and rows >= period_rows:
            pattern = jnp.tile(var, lcm_dl // D).reshape(period_rows, _LANE)
            block_rows, grid_n = _choose_block_rows(rows, itemsize, period_rows)

            obs_var_flat = pl.pallas_call(
                _var_pattern_kernel,
                out_shape=jax.ShapeDtypeStruct((rows, _LANE), dtype),
                grid_spec=pl.GridSpec(
                    grid=(grid_n,),
                    in_specs=[pl.BlockSpec((period_rows, _LANE), lambda i: (0, 0))],
                    out_specs=pl.BlockSpec((block_rows, _LANE), lambda i: (i, 0)),
                ),
                compiler_params=pltpu.CompilerParams(
                    dimension_semantics=("parallel",),
                ),
            )(pattern)
            return obs_mu, obs_var_flat.reshape(S, B, D)

    # General fallback: many samples per grid step; last two block dims equal the
    # full array extents so the (8, 128) divisibility rule is satisfied.
    var2d = var.reshape(1, D)
    bytes_per_sample = max(1, B * D * itemsize)
    s_blk = max(1, min(S, _TARGET_BLOCK_BYTES // bytes_per_sample))
    obs_var = pl.pallas_call(
        _var_general_kernel,
        out_shape=jax.ShapeDtypeStruct((S, B, D), dtype),
        grid_spec=pl.GridSpec(
            grid=(pl.cdiv(S, s_blk),),
            in_specs=[pl.BlockSpec((1, D), lambda s: (0, 0))],
            out_specs=pl.BlockSpec((s_blk, B, D), lambda s: (s, 0, 0)),
        ),
        compiler_params=pltpu.CompilerParams(
            dimension_semantics=("parallel",),
        ),
    )(var2d)
    return obs_mu, obs_var


# TODO(synk): GaussianLikelihood.loss / .predict (Normal log-prob, NLL reduction)
# are not part of forward() and are left to plain JAX.


if __name__ == "__main__":
    key = jax.random.PRNGKey(0)
    noise_std_scalar = 0.1

    def check(S, B, D, **kwargs):
        k = jax.random.fold_in(key, S * 100003 + B * 1009 + D)
        noise_std = noise_std_scalar * jnp.ones((D,), dtype=jnp.float32)
        mu = jax.random.normal(k, (S, B, D), dtype=jnp.float32)

        obs_mu, obs_var = gaussian_likelihood_forward(mu, noise_std, **kwargs)
        obs_mu = jax.block_until_ready(obs_mu)
        obs_var = jax.block_until_ready(obs_var)

        ref_mu = mu
        ref_var = jnp.zeros_like(mu) + jnp.square(noise_std)
        assert obs_mu.shape == (S, B, D) and obs_var.shape == (S, B, D)
        assert jnp.allclose(obs_mu, ref_mu)
        assert jnp.allclose(obs_var, ref_var)

    # 1) Module-docstring-sized tiny case -> XLA bypass path.
    check(4, 8, 16)
    # 2) Lane-dense Pallas path (above the bypass threshold, total % 128 == 0).
    check(16, 64, 128)
    # 3) General fallback Pallas path (total % 128 != 0), forced past the bypass.
    check(5, 7, 9, min_pallas_elems=0)

    print("KERNEL_OK")
</pallas_src>

<mosaic_0001>
module attributes {stable_mosaic.version = 11 : i64} {
  func.func @_var_pattern_kernel(%arg0: i32, %arg1: memref<1x128xf32, #tpu.memory_space<vmem>>, %arg2: memref<1024x128xf32, #tpu.memory_space<vmem>>) attributes {dimension_semantics = [#tpu.dimension_semantics<parallel>], iteration_bounds = array<i64: 1>, scalar_prefetch = 0 : i64, scratch_operands = 0 : i64, tpu.core_type = #tpu.core_type<tc>, window_params = [{pipeline_mode = #tpu.pipeline_mode<synchronous>, transform_indices = @transform_0, window_bounds = array<i64: 1, 128>}, {transform_indices = @transform_1, window_bounds = array<i64: 1024, 128>}]} {
    %c0 = arith.constant 0 : index
    %c0_0 = arith.constant 0 : index
    %0 = vector.load %arg1[%c0, %c0_0] : memref<1x128xf32, #tpu.memory_space<vmem>>, vector<1x128xf32>
    %1 = vector.shape_cast %0 : vector<1x128xf32> to vector<1x128xf32>
    %2 = vector.broadcast %1 : vector<1x128xf32> to vector<1024x128xf32>
    %c0_1 = arith.constant 0 : index
    %c0_2 = arith.constant 0 : index
    %3 = vector.load %arg2[%c0_1, %c0_2] : memref<1024x128xf32, #tpu.memory_space<vmem>>, vector<1024x128xf32>
    tpu.vector_store %arg2[%c0_1, %c0_2], %2 {strides = array<i32>} : memref<1024x128xf32, #tpu.memory_space<vmem>>, vector<1024x128xf32>,
    return
  }
  func.func @transform_0(%arg0: i32) -> (i32, i32) {
    %c0_i32 = arith.constant 0 : i32
    %c0_i32_0 = arith.constant 0 : i32
    %c0_i32_1 = arith.constant 0 : i32
    return %c0_i32, %c0_i32_0 : i32, i32
  }
  func.func @transform_1(%arg0: i32) -> (i32, i32) {
    %c0_i32 = arith.constant 0 : i32
    %c0_i32_0 = arith.constant 0 : i32
    return %arg0, %c0_i32 : i32, i32
  }
}

</mosaic_0001>

<bundles_post_ra>
// kernel: tpu_custom_call.1
= control target key start
LH: loop header
LB: loop body
LE: loop exit
PB: predicated region body
PF: predicated region fallthrough
CT: control target
= control target key end

     0   :  { %6 = vsyncpa [#allocation3], 0  ;;  %s381_s0 = inlined_call_operand.hbm [shape: f32[1,128], index: 0, kind: input, shape index: {}]   ;;  %s382_s1 = inlined_call_operand.hbm [shape: f32[1024,128], index: 1, kind: output, shape index: {}]  }
   0x1   :  { %7 = vsyncpa [#allocation4], 0  ;;  %s13_s8 = sshll.u32 %s381_s0, 4  ;;  %s231_s9 = smov [#allocation2]   ;;  %s14_s8 = int_to_ptr.hbm [resolvable:$true] %s13_s8 }
   0x2   :  { %s15_s10 = sshll.u32 %s231_s9, 4  ;;  %s16_s10 = int_to_ptr.vmem [resolvable:$true] %s15_s10 }
   0x3   :  { %18 = dma.hbm_to_vmem [thread:$0]  %s14_s8, 16, %s16_s10, [#allocation3]  }
   0x4   :  { %227 = dma.done.wait [#allocation3], 16  }
   0x5   :  { %228 = vsyncadd [#allocation3], 4294967280  ;;  %v248_v0 = vld [vmem:[#allocation2] ss:$0 sm:$0xff]  ;;  %s232_s0 = smov [#allocation5]   ;;  %s161_s14 = sshll.u32 %s382_s1, 4  ;;  %s162_s14 = int_to_ptr.hbm [resolvable:$true] %s161_s14 }
   0x6   :  { %27 = vst [vmem:[#allocation5] sm:$0xff] %v248_v0  ;;  %s159_s11 = sshll.u32 %s232_s0, 4  ;;  %s233_s15 = smov 128   ;;  %s160_s11 = int_to_ptr.vmem [resolvable:$true] %s159_s11 }
   0x7   :  { %28 = vst [vmem:[#allocation5 + $0x8] sm:$0xff] %v248_v0  ;;  %s234_s16 = smov 8  }
   0x8   :  { %29 = vst [vmem:[#allocation5 + $0x10] sm:$0xff] %v248_v0 }
   0x9   :  { %30 = vst [vmem:[#allocation5 + $0x18] sm:$0xff] %v248_v0 }
   0xa   :  { %31 = vst [vmem:[#allocation5 + $0x20] sm:$0xff] %v248_v0 }
   0xb   :  { %32 = vst [vmem:[#allocation5 + $0x28] sm:$0xff] %v248_v0 }
   0xc   :  { %33 = vst [vmem:[#allocation5 + $0x30] sm:$0xff] %v248_v0 }
   0xd   :  { %34 = vst [vmem:[#allocation5 + $0x38] sm:$0xff] %v248_v0 }
   0xe   :  { %35 = vst [vmem:[#allocation5 + $0x40] sm:$0xff] %v248_v0 }
   0xf   :  { %36 = vst [vmem:[#allocation5 + $0x48] sm:$0xff] %v248_v0 }
  0x10   :  { %37 = vst [vmem:[#allocation5 + $0x50] sm:$0xff] %v248_v0 }
  0x11   :  { %38 = vst [vmem:[#allocation5 + $0x58] sm:$0xff] %v248_v0 }
  0x12   :  { %39 = vst [vmem:[#allocation5 + $0x60] sm:$0xff] %v248_v0 }
  0x13   :  { %40 = vst [vmem:[#allocation5 + $0x68] sm:$0xff] %v248_v0 }
  0x14   :  { %41 = vst [vmem:[#allocation5 + $0x70] sm:$0xff] %v248_v0 }
  0x15   :  { %42 = vst [vmem:[#allocation5 + $0x78] sm:$0xff] %v248_v0 }
  0x16   :  { %43 = vst [vmem:[#allocation5 + $0x80] sm:$0xff] %v248_v0 }
  0x17   :  { %44 = vst [vmem:[#allocation5 + $0x88] sm:$0xff] %v248_v0 }
  0x18   :  { %45 = vst [vmem:[#allocation5 + $0x90] sm:$0xff] %v248_v0 }
  0x19   :  { %46 = vst [vmem:[#allocation5 + $0x98] sm:$0xff] %v248_v0 }
  0x1a   :  { %47 = vst [vmem:[#allocation5 + $0xa0] sm:$0xff] %v248_v0 }
  0x1b   :  { %48 = vst [vmem:[#allocation5 + $0xa8] sm:$0xff] %v248_v0 }
  0x1c   :  { %49 = vst [vmem:[#allocation5 + $0xb0] sm:$0xff] %v248_v0 }
  0x1d   :  { %50 = vst [vmem:[#allocation5 + $0xb8] sm:$0xff] %v248_v0 }
  0x1e   :  { %51 = vst [vmem:[#allocation5 + $0xc0] sm:$0xff] %v248_v0 }
  0x1f   :  { %52 = vst [vmem:[#allocation5 + $0xc8] sm:$0xff] %v248_v0 }
  0x20   :  { %53 = vst [vmem:[#allocation5 + $0xd0] sm:$0xff] %v248_v0 }
  0x21   :  { %54 = vst [vmem:[#allocation5 + $0xd8] sm:$0xff] %v248_v0 }
  0x22   :  { %55 = vst [vmem:[#allocation5 + $0xe0] sm:$0xff] %v248_v0 }
  0x23   :  { %56 = vst [vmem:[#allocation5 + $0xe8] sm:$0xff] %v248_v0 }
  0x24   :  { %57 = vst [vmem:[#allocation5 + $0xf0] sm:$0xff] %v248_v0 }
  0x25   :  { %58 = vst [vmem:[#allocation5 + $0xf8] sm:$0xff] %v248_v0 }
  0x26   :  { %59 = vst [vmem:[#allocation5 + $0x100] sm:$0xff] %v248_v0 }
  0x27   :  { %60 = vst [vmem:[#allocation5 + $0x108] sm:$0xff] %v248_v0 }
  0x28   :  { %61 = vst [vmem:[#allocation5 + $0x110] sm:$0xff] %v248_v0 }
  0x29   :  { %62 = vst [vmem:[#allocation5 + $0x118] sm:$0xff] %v248_v0 }
  0x2a   :  { %63 = vst [vmem:[#allocation5 + $0x120] sm:$0xff] %v248_v0 }
  0x2b   :  { %64 = vst [vmem:[#allocation5 + $0x128] sm:$0xff] %v248_v0 }
  0x2c   :  { %65 = vst [vmem:[#allocation5 + $0x130] sm:$0xff] %v248_v0 }
  0x2d   :  { %66 = vst [vmem:[#allocation5 + $0x138] sm:$0xff] %v248_v0 }
  0x2e   :  { %67 = vst [vmem:[#allocation5 + $0x140] sm:$0xff] %v248_v0 }
  0x2f   :  { %68 = vst [vmem:[#allocation5 + $0x148] sm:$0xff] %v248_v0 }
  0x30   :  { %69 = vst [vmem:[#allocation5 + $0x150] sm:$0xff] %v248_v0 }
  0x31   :  { %70 = vst [vmem:[#allocation5 + $0x158] sm:$0xff] %v248_v0 }
  0x32   :  { %71 = vst [vmem:[#allocation5 + $0x160] sm:$0xff] %v248_v0 }
  0x33   :  { %72 = vst [vmem:[#allocation5 + $0x168] sm:$0xff] %v248_v0 }
  0x34   :  { %73 = vst [vmem:[#allocation5 + $0x170] sm:$0xff] %v248_v0 }
  0x35   :  { %74 = vst [vmem:[#allocation5 + $0x178] sm:$0xff] %v248_v0 }
  0x36   :  { %75 = vst [vmem:[#allocation5 + $0x180] sm:$0xff] %v248_v0 }
  0x37   :  { %76 = vst [vmem:[#allocation5 + $0x188] sm:$0xff] %v248_v0 }
  0x38   :  { %77 = vst [vmem:[#allocation5 + $0x190] sm:$0xff] %v248_v0 }
  0x39   :  { %78 = vst [vmem:[#allocation5 + $0x198] sm:$0xff] %v248_v0 }
  0x3a   :  { %79 = vst [vmem:[#allocation5 + $0x1a0] sm:$0xff] %v248_v0 }
  0x3b   :  { %80 = vst [vmem:[#allocation5 + $0x1a8] sm:$0xff] %v248_v0 }
  0x3c   :  { %81 = vst [vmem:[#allocation5 + $0x1b0] sm:$0xff] %v248_v0 }
  0x3d   :  { %82 = vst [vmem:[#allocation5 + $0x1b8] sm:$0xff] %v248_v0 }
  0x3e   :  { %83 = vst [vmem:[#allocation5 + $0x1c0] sm:$0xff] %v248_v0 }
  0x3f   :  { %84 = vst [vmem:[#allocation5 + $0x1c8] sm:$0xff] %v248_v0 }
  0x40   :  { %85 = vst [vmem:[#allocation5 + $0x1d0] sm:$0xff] %v248_v0 }
  0x41   :  { %86 = vst [vmem:[#allocation5 + $0x1d8] sm:$0xff] %v248_v0 }
  0x42   :  { %87 = vst [vmem:[#allocation5 + $0x1e0] sm:$0xff] %v248_v0 }
  0x43   :  { %88 = vst [vmem:[#allocation5 + $0x1e8] sm:$0xff] %v248_v0 }
  0x44   :  { %89 = vst [vmem:[#allocation5 + $0x1f0] sm:$0xff] %v248_v0 }
  0x45   :  { %90 = vst [vmem:[#allocation5 + $0x1f8] sm:$0xff] %v248_v0 }
  0x46   :  { %91 = vst [vmem:[#allocation5 + $0x200] sm:$0xff] %v248_v0 }
  0x47   :  { %92 = vst [vmem:[#allocation5 + $0x208] sm:$0xff] %v248_v0 }
  0x48   :  { %93 = vst [vmem:[#allocation5 + $0x210] sm:$0xff] %v248_v0 }
  0x49   :  { %94 = vst [vmem:[#allocation5 + $0x218] sm:$0xff] %v248_v0 }
  0x4a   :  { %95 = vst [vmem:[#allocation5 + $0x220] sm:$0xff] %v248_v0 }
  0x4b   :  { %96 = vst [vmem:[#allocation5 + $0x228] sm:$0xff] %v248_v0 }
  0x4c   :  { %97 = vst [vmem:[#allocation5 + $0x230] sm:$0xff] %v248_v0 }
  0x4d   :  { %98 = vst [vmem:[#allocation5 + $0x238] sm:$0xff] %v248_v0 }
  0x4e   :  { %99 = vst [vmem:[#allocation5 + $0x240] sm:$0xff] %v248_v0 }
  0x4f   :  { %100 = vst [vmem:[#allocation5 + $0x248] sm:$0xff] %v248_v0 }
  0x50   :  { %101 = vst [vmem:[#allocation5 + $0x250] sm:$0xff] %v248_v0 }
  0x51   :  { %102 = vst [vmem:[#allocation5 + $0x258] sm:$0xff] %v248_v0 }
  0x52   :  { %103 = vst [vmem:[#allocation5 + $0x260] sm:$0xff] %v248_v0 }
  0x53   :  { %104 = vst [vmem:[#allocation5 + $0x268] sm:$0xff] %v248_v0 }
  0x54   :  { %105 = vst [vmem:[#allocation5 + $0x270] sm:$0xff] %v248_v0 }
  0x55   :  { %106 = vst [vmem:[#allocation5 + $0x278] sm:$0xff] %v248_v0 }
  0x56   :  { %107 = vst [vmem:[#allocation5 + $0x280] sm:$0xff] %v248_v0 }
  0x57   :  { %108 = vst [vmem:[#allocation5 + $0x288] sm:$0xff] %v248_v0 }
  0x58   :  { %109 = vst [vmem:[#allocation5 + $0x290] sm:$0xff] %v248_v0 }
  0x59   :  { %110 = vst [vmem:[#allocation5 + $0x298] sm:$0xff] %v248_v0 }
  0x5a   :  { %111 = vst [vmem:[#allocation5 + $0x2a0] sm:$0xff] %v248_v0 }
  0x5b   :  { %112 = vst [vmem:[#allocation5 + $0x2a8] sm:$0xff] %v248_v0 }
  0x5c   :  { %113 = vst [vmem:[#allocation5 + $0x2b0] sm:$0xff] %v248_v0 }
  0x5d   :  { %114 = vst [vmem:[#allocation5 + $0x2b8] sm:$0xff] %v248_v0 }
  0x5e   :  { %115 = vst [vmem:[#allocation5 + $0x2c0] sm:$0xff] %v248_v0 }
  0x5f   :  { %116 = vst [vmem:[#allocation5 + $0x2c8] sm:$0xff] %v248_v0 }
  0x60   :  { %117 = vst [vmem:[#allocation5 + $0x2d0] sm:$0xff] %v248_v0 }
  0x61   :  { %118 = vst [vmem:[#allocation5 + $0x2d8] sm:$0xff] %v248_v0 }
  0x62   :  { %119 = vst [vmem:[#allocation5 + $0x2e0] sm:$0xff] %v248_v0 }
  0x63   :  { %120 = vst [vmem:[#allocation5 + $0x2e8] sm:$0xff] %v248_v0 }
  0x64   :  { %121 = vst [vmem:[#allocation5 + $0x2f0] sm:$0xff] %v248_v0 }
  0x65   :  { %122 = vst [vmem:[#allocation5 + $0x2f8] sm:$0xff] %v248_v0 }
  0x66   :  { %123 = vst [vmem:[#allocation5 + $0x300] sm:$0xff] %v248_v0 }
  0x67   :  { %124 = vst [vmem:[#allocation5 + $0x308] sm:$0xff] %v248_v0 }
  0x68   :  { %125 = vst [vmem:[#allocation5 + $0x310] sm:$0xff] %v248_v0 }
  0x69   :  { %126 = vst [vmem:[#allocation5 + $0x318] sm:$0xff] %v248_v0 }
  0x6a   :  { %127 = vst [vmem:[#allocation5 + $0x320] sm:$0xff] %v248_v0 }
  0x6b   :  { %128 = vst [vmem:[#allocation5 + $0x328] sm:$0xff] %v248_v0 }
  0x6c   :  { %129 = vst [vmem:[#allocation5 + $0x330] sm:$0xff] %v248_v0 }
  0x6d   :  { %130 = vst [vmem:[#allocation5 + $0x338] sm:$0xff] %v248_v0 }
  0x6e   :  { %131 = vst [vmem:[#allocation5 + $0x340] sm:$0xff] %v248_v0 }
  0x6f   :  { %132 = vst [vmem:[#allocation5 + $0x348] sm:$0xff] %v248_v0 }
  0x70   :  { %133 = vst [vmem:[#allocation5 + $0x350] sm:$0xff] %v248_v0 }
  0x71   :  { %134 = vst [vmem:[#allocation5 + $0x358] sm:$0xff] %v248_v0 }
  0x72   :  { %135 = vst [vmem:[#allocation5 + $0x360] sm:$0xff] %v248_v0 }
  0x73   :  { %136 = vst [vmem:[#allocation5 + $0x368] sm:$0xff] %v248_v0 }
  0x74   :  { %137 = vst [vmem:[#allocation5 + $0x370] sm:$0xff] %v248_v0 }
  0x75   :  { %138 = vst [vmem:[#allocation5 + $0x378] sm:$0xff] %v248_v0 }
  0x76   :  { %139 = vst [vmem:[#allocation5 + $0x380] sm:$0xff] %v248_v0 }
  0x77   :  { %140 = vst [vmem:[#allocation5 + $0x388] sm:$0xff] %v248_v0 }
  0x78   :  { %141 = vst [vmem:[#allocation5 + $0x390] sm:$0xff] %v248_v0 }
  0x79   :  { %142 = vst [vmem:[#allocation5 + $0x398] sm:$0xff] %v248_v0 }
  0x7a   :  { %143 = vst [vmem:[#allocation5 + $0x3a0] sm:$0xff] %v248_v0 }
  0x7b   :  { %144 = vst [vmem:[#allocation5 + $0x3a8] sm:$0xff] %v248_v0 }
  0x7c   :  { %145 = vst [vmem:[#allocation5 + $0x3b0] sm:$0xff] %v248_v0 }
  0x7d   :  { %146 = vst [vmem:[#allocation5 + $0x3b8] sm:$0xff] %v248_v0 }
  0x7e   :  { %147 = vst [vmem:[#allocation5 + $0x3c0] sm:$0xff] %v248_v0 }
  0x7f   :  { %148 = vst [vmem:[#allocation5 + $0x3c8] sm:$0xff] %v248_v0 }
  0x80   :  { %149 = vst [vmem:[#allocation5 + $0x3d0] sm:$0xff] %v248_v0 }
  0x81   :  { %150 = vst [vmem:[#allocation5 + $0x3d8] sm:$0xff] %v248_v0 }
  0x82   :  { %151 = vst [vmem:[#allocation5 + $0x3e0] sm:$0xff] %v248_v0 }
  0x83   :  { %152 = vst [vmem:[#allocation5 + $0x3e8] sm:$0xff] %v248_v0 }
  0x84   :  { %153 = vst [vmem:[#allocation5 + $0x3f0] sm:$0xff] %v248_v0 }
  0x85   :  { %154 = vst [vmem:[#allocation5 + $0x3f8] sm:$0xff] %v248_v0 }
  0x86   :  { %167 = dma.vmem_to_hbm [thread:$0]  %s160_s11, 16384, %s162_s14, [#allocation4], %s233_s15, %s233_s15, %s234_s16  }
  0x87   :  { %229 = dma.done.wait [#allocation4], 16384  }
  0x88   :  { %230 = vsyncadd [#allocation4], 4294950912 }
  0x89   :  { %172 = vsyncpa [#allocation3], 1 }
  0x8a   :  { %173 = vsyncpa [#allocation4], 1 }

</bundles_post_ra>
